<compile_context>
chip_gen: v5e
topology: v5e:2x2
jax: 0.10.0
libtpu: 0.0.40
codegen_flags: <defaults>
</compile_context>

<pallas_src>
import functools

import jax
import jax.numpy as jnp
from jax import lax
from jax.experimental import pallas as pl
from jax.experimental.pallas import tpu as pltpu

ALPHA = 0.25
GAMMA = 2.0  # hard-coded below as an explicit square


def focal_loss_kernel(logits_ref, targets_ref, out_ref, *, n_total, tile_n, tiles_per_core):
    c = pl.program_id(0)   # core-split axis ("parallel": one value per TC on v7x)
    i = pl.program_id(1)   # tile axis within this core's batch slice ("arbitrary")

    @pl.when(i == 0)
    def _():
        out_ref[...] = jnp.zeros_like(out_ref)   # per-core resident accumulator

    x = logits_ref[...].astype(jnp.float32)   # (TN, C); DMA stays native dtype, upcast in VMEM
    t = targets_ref[...]                      # (TN, 1) int32
    tn, nc = x.shape

    # Logical (unclamped) block index.  The index_map clamps the DMA to a valid block;
    # rows of a fully out-of-range logical block get logical row ids >= n_total and are
    # masked out here, so a duplicated/clamped tile never double-counts.
    logical_blk = c * tiles_per_core + i
    row_ids = logical_blk * tile_n + lax.broadcasted_iota(jnp.int32, (tn, 1), 0)
    valid = row_ids < n_total                 # (TN, 1) bool

    # Select the target logit without a gather or float one-hot matmul.
    col_ids = lax.broadcasted_iota(jnp.int32, (tn, nc), 1)
    target_logit = jnp.sum(jnp.where(col_ids == t, x, 0.0), axis=1, keepdims=True)  # (TN, 1)

    # Numerically stable logsumexp over classes.
    m = jnp.max(x, axis=1, keepdims=True)                                   # (TN, 1)
    lse = m + jnp.log(jnp.sum(jnp.exp(x - m), axis=1, keepdims=True))       # (TN, 1)

    # Clamp guarantees pt = exp(-ce) <= 1 (differs from PyTorch only by an ulp-scale
    # rounding clamp when lse rounds marginally below the target logit).
    ce = jnp.maximum(lse - target_logit, 0.0)
    pt = jnp.exp(-ce)
    one_minus_pt = 1.0 - pt
    focal = ALPHA * (one_minus_pt * one_minus_pt) * ce   # gamma == 2 as explicit square

    # Select (not multiply): keeps NaN/Inf from uninitialized padded rows out of the sum.
    focal = jnp.where(valid, focal, 0.0)
    out_ref[...] += jnp.sum(focal)            # f32 per-core partial sum


def _tpu_vmem_bytes():
    try:
        return int(pltpu.get_tpu_info().vmem_capacity_bytes)
    except Exception:
        return 64 * 1024 * 1024   # conservative (v7x-sized per-core VMEM) fallback


def _pick_tile_n(n, c, itemsize, vmem_limit_bytes):
    """Rows per logits tile.

    Budget ~75% of the scoped VMEM limit for the double-buffered native-dtype logits
    stream plus ~4 f32-sized in-kernel intermediates per block row (upcast x,
    exp(x - m), iota, select results); round to the dtype's sublane packing.
    """
    pack = max(8, 32 // max(itemsize, 1))          # 8 rows f32, 16 bf16, 32 int8/fp8
    per_row_bytes = c * (2 * itemsize + 4 * 4)
    usable = (vmem_limit_bytes * 3) // 4
    rows = max(pack, (usable // max(per_row_bytes, 1)) // pack * pack)
    rows = min(rows, -(-n // pack) * pack)         # no point exceeding the (padded) batch
    return rows


def focal_loss(logits, targets, *, tile_n=None, num_cores=2):
    """logits: (N, C) float (f32/bf16/...); targets: (N,) int class indices -> scalar f32 mean.

    NOTE: lane density is best when C is a multiple of 128; small C (e.g. 32) under-uses
    vreg lanes.  See TODO(synk) at the top of the file.
    """
    n, c = logits.shape
    vmem_bytes = _tpu_vmem_bytes()
    vmem_limit = min(64 * 1024 * 1024, vmem_bytes // 2)   # 64 MiB on v5e/v6e, 32 MiB on v7x
    if tile_n is None:
        tile_n = _pick_tile_n(n, c, logits.dtype.itemsize, vmem_limit)

    grid_n = pl.cdiv(n, tile_n)
    tiles_per_core = pl.cdiv(grid_n, num_cores)
    last_blk = grid_n - 1

    # Clamp so the (at most one) duplicated tile on the second core never issues an
    # out-of-bounds DMA; its rows are masked inside the kernel via the logical row id.
    def rows_map(cc, ii):
        return (jnp.minimum(cc * tiles_per_core + ii, last_blk), 0)

    targets_2d = targets.astype(jnp.int32).reshape(n, 1)
    kernel = functools.partial(
        focal_loss_kernel, n_total=n, tile_n=tile_n, tiles_per_core=tiles_per_core)

    partial_sums = pl.pallas_call(
        kernel,
        out_shape=jax.ShapeDtypeStruct((num_cores, 1, 1), jnp.float32),
        grid=(num_cores, tiles_per_core),
        in_specs=[
            pl.BlockSpec((tile_n, c), rows_map),   # native dtype, no wrapper cast
            pl.BlockSpec((tile_n, 1), rows_map),
        ],
        out_specs=pl.BlockSpec((1, 1, 1), lambda cc, ii: (cc, 0, 0)),  # per-core accumulator
        compiler_params=pltpu.CompilerParams(
            dimension_semantics=("parallel", "arbitrary"),
            vmem_limit_bytes=vmem_limit,
        ),
    )(logits, targets_2d)

    # Cross-core reduce + mean over the GLOBAL batch done in the wrapper (tiny XLA op).
    return jnp.sum(partial_sums) * (1.0 / n)


def focal_loss_ref(logits, targets):
    """Pure-JAX reference mirroring the PyTorch module (for verification)."""
    logits = logits.astype(jnp.float32)
    lse = jax.scipy.special.logsumexp(logits, axis=1)
    tgt = jnp.take_along_axis(logits, targets[:, None].astype(jnp.int32), axis=1)[:, 0]
    ce = lse - tgt
    pt = jnp.exp(-ce)
    return jnp.mean(ALPHA * (1.0 - pt) ** GAMMA * ce)


if __name__ == "__main__":
    key = jax.random.PRNGKey(0)
    k1, k2, k3, k4 = jax.random.split(key, 4)

    # Small shapes consistent with an (N, C) classification loss.
    N, C = 24, 32
    logits = jax.random.normal(k1, (N, C), dtype=jnp.float32)
    targets = jax.random.randint(k2, (N,), 0, C, dtype=jnp.int32)
    ref = focal_loss_ref(logits, targets)

    # Multi-tile path: 3 row tiles split across the 2-way core axis (exercises the
    # per-core accumulators and the clamped duplicate tile).
    loss = focal_loss(logits, targets, tile_n=8)
    jax.block_until_ready(loss)
    assert jnp.allclose(loss, ref, rtol=1e-5, atol=1e-5), (loss, ref)

    # Auto (generation-aware) tile sizing.
    loss_auto = focal_loss(logits, targets)
    jax.block_until_ready(loss_auto)
    assert jnp.allclose(loss_auto, ref, rtol=1e-5, atol=1e-5), (loss_auto, ref)

    # Ragged batch with bf16 logits: native-dtype DMA + in-kernel upcast, tile rows
    # aligned to bf16 sublane packing (16), masked tail rows on the second core.
    N2 = 20
    logits2 = jax.random.normal(k3, (N2, C), dtype=jnp.float32).astype(jnp.bfloat16)
    targets2 = jax.random.randint(k4, (N2,), 0, C, dtype=jnp.int32)
    loss2 = focal_loss(logits2, targets2, tile_n=16)
    jax.block_until_ready(loss2)
    ref2 = focal_loss_ref(logits2, targets2)
    assert jnp.allclose(loss2, ref2, rtol=1e-4, atol=1e-5), (loss2, ref2)

    print("KERNEL_OK")
</pallas_src>

<mosaic_0001>
module attributes {stable_mosaic.version = 11 : i64} {
  func.func @focal_loss_kernel(%arg0: i32, %arg1: i32, %arg2: memref<8x32xf32, #tpu.memory_space<vmem>>, %arg3: memref<8x1xi32, #tpu.memory_space<vmem>>, %arg4: memref<1x1x1xf32, #tpu.memory_space<vmem>>) attributes {dimension_semantics = [#tpu.dimension_semantics<parallel>, #tpu.dimension_semantics<arbitrary>], iteration_bounds = array<i64: 2, 2>, scalar_prefetch = 0 : i64, scratch_operands = 0 : i64, tpu.core_type = #tpu.core_type<tc>, window_params = [{transform_indices = @transform_0, window_bounds = array<i64: 8, 32>}, {transform_indices = @transform_1, window_bounds = array<i64: 8, 1>}, {transform_indices = @transform_2, window_bounds = array<i64: 1, 1, 1>}]} {
    %c0_i32 = arith.constant 0 : i32
    %0 = arith.cmpi eq, %arg1, %c0_i32 : i32
    %1 = arith.extui %0 : i1 to i32
    %c0_i32_0 = arith.constant 0 : i32
    %2 = arith.cmpi ne, %1, %c0_i32_0 : i32
    scf.if %2 {
      %cst_19 = arith.constant 0.000000e+00 : f32
      %51 = vector.broadcast %cst_19 : f32 to vector<1x1x1xf32>
      %c0_20 = arith.constant 0 : index
      %c0_21 = arith.constant 0 : index
      %c0_22 = arith.constant 0 : index
      %52 = vector.load %arg4[%c0_20, %c0_21, %c0_22] : memref<1x1x1xf32, #tpu.memory_space<vmem>>, vector<1x1x1xf32>
      tpu.vector_store %arg4[%c0_20, %c0_21, %c0_22], %51 {strides = array<i32>} : memref<1x1x1xf32, #tpu.memory_space<vmem>>, vector<1x1x1xf32>,
    } else {
    }
    %c0 = arith.constant 0 : index
    %c0_1 = arith.constant 0 : index
    %3 = vector.load %arg2[%c0, %c0_1] : memref<8x32xf32, #tpu.memory_space<vmem>>, vector<8x32xf32>
    %c0_2 = arith.constant 0 : index
    %c0_3 = arith.constant 0 : index
    %4 = vector.load %arg3[%c0_2, %c0_3] : memref<8x1xi32, #tpu.memory_space<vmem>>, vector<8x1xi32>
    %c2_i32 = arith.constant 2 : i32
    %5 = arith.muli %arg0, %c2_i32 : i32
    %6 = arith.addi %5, %arg1 : i32
    %c8_i32 = arith.constant 8 : i32
    %7 = arith.muli %6, %c8_i32 : i32
    %8 = tpu.iota {dimensions = array<i32: 0>} : vector<8x1xi32>
    %9 = vector.broadcast %7 : i32 to vector<8x1xi32>
    %10 = arith.addi %9, %8 : vector<8x1xi32>
    %c24_i32 = arith.constant 24 : i32
    %11 = vector.broadcast %c24_i32 : i32 to vector<8x1xi32>
    %12 = arith.cmpi slt, %10, %11 : vector<8x1xi32>
    %13 = tpu.iota {dimensions = array<i32: 1>} : vector<8x32xi32>
    %14 = vector.broadcast %4 : vector<8x1xi32> to vector<8x32xi32>
    %15 = arith.cmpi eq, %13, %14 : vector<8x32xi32>
    %cst = arith.constant 0.000000e+00 : f32
    %16 = vector.broadcast %cst : f32 to vector<8x32xf32>
    %17 = arith.select %15, %3, %16 : vector<8x32xi1>, vector<8x32xf32>
    %cst_4 = arith.constant dense<0.000000e+00> : vector<8xf32>
    %18 = vector.multi_reduction <add>, %17, %cst_4 [1] : vector<8x32xf32> to vector<8xf32>
    %19 = vector.shape_cast %18 : vector<8xf32> to vector<8x1xf32>
    %cst_5 = arith.constant dense<0xFF800000> : vector<8xf32>
    %20 = vector.multi_reduction <maximumf>, %3, %cst_5 [1] : vector<8x32xf32> to vector<8xf32>
    %21 = vector.shape_cast %20 : vector<8xf32> to vector<8x1xf32>
    %22 = vector.broadcast %21 : vector<8x1xf32> to vector<8x32xf32>
    %23 = arith.subf %3, %22 : vector<8x32xf32>
    %24 = math.exp %23 : vector<8x32xf32>
    %cst_6 = arith.constant dense<0.000000e+00> : vector<8xf32>
    %25 = vector.multi_reduction <add>, %24, %cst_6 [1] : vector<8x32xf32> to vector<8xf32>
    %26 = vector.shape_cast %25 : vector<8xf32> to vector<8x1xf32>
    %27 = math.log %26 : vector<8x1xf32>
    %28 = arith.addf %21, %27 : vector<8x1xf32>
    %29 = arith.subf %28, %19 : vector<8x1xf32>
    %cst_7 = arith.constant 0.000000e+00 : f32
    %30 = vector.broadcast %cst_7 : f32 to vector<8x1xf32>
    %31 = arith.maximumf %29, %30 : vector<8x1xf32>
    %cst_8 = arith.constant 0.000000e+00 : f32
    %32 = vector.broadcast %cst_8 : f32 to vector<8x1xf32>
    %33 = arith.subf %32, %31 : vector<8x1xf32>
    %34 = math.exp %33 : vector<8x1xf32>
    %cst_9 = arith.constant 1.000000e+00 : f32
    %35 = vector.broadcast %cst_9 : f32 to vector<8x1xf32>
    %36 = arith.subf %35, %34 : vector<8x1xf32>
    %37 = arith.mulf %36, %36 : vector<8x1xf32>
    %cst_10 = arith.constant 2.500000e-01 : f32
    %38 = vector.broadcast %cst_10 : f32 to vector<8x1xf32>
    %39 = arith.mulf %38, %37 : vector<8x1xf32>
    %40 = arith.mulf %39, %31 : vector<8x1xf32>
    %cst_11 = arith.constant 0.000000e+00 : f32
    %41 = vector.broadcast %cst_11 : f32 to vector<8x1xf32>
    %42 = arith.select %12, %40, %41 : vector<8x1xi1>, vector<8x1xf32>
    %c0_12 = arith.constant 0 : index
    %c0_13 = arith.constant 0 : index
    %c0_14 = arith.constant 0 : index
    %43 = vector.load %arg4[%c0_12, %c0_13, %c0_14] : memref<1x1x1xf32, #tpu.memory_space<vmem>>, vector<1x1x1xf32>
    %44 = vector.shape_cast %42 : vector<8x1xf32> to vector<1x8x1xf32>
    %cst_15 = arith.constant dense<0.000000e+00> : vector<1xf32>
    %45 = vector.multi_reduction <add>, %44, %cst_15 [1, 2] : vector<1x8x1xf32> to vector<1xf32>
    %46 = vector.shape_cast %45 : vector<1xf32> to vector<1x1x1xf32>
    %47 = vector.extract %46[0, 0, 0] : f32 from vector<1x1x1xf32>
    %48 = vector.broadcast %47 : f32 to vector<1x1x1xf32>
    %49 = arith.addf %43, %48 : vector<1x1x1xf32>
    %c0_16 = arith.constant 0 : index
    %c0_17 = arith.constant 0 : index
    %c0_18 = arith.constant 0 : index
    %50 = vector.load %arg4[%c0_16, %c0_17, %c0_18] : memref<1x1x1xf32, #tpu.memory_space<vmem>>, vector<1x1x1xf32>
    tpu.vector_store %arg4[%c0_16, %c0_17, %c0_18], %49 {strides = array<i32>} : memref<1x1x1xf32, #tpu.memory_space<vmem>>, vector<1x1x1xf32>,
    return
  }
  func.func @transform_0(%arg0: i32, %arg1: i32) -> (i32, i32) {
    %c2_i32 = arith.constant 2 : i32
    %0 = arith.muli %arg0, %c2_i32 : i32
    %1 = arith.addi %0, %arg1 : i32
    %c2_i32_0 = arith.constant 2 : i32
    %2 = arith.minsi %1, %c2_i32_0 : i32
    %c0_i32 = arith.constant 0 : i32
    %c0_i32_1 = arith.constant 0 : i32
    return %2, %c0_i32 : i32, i32
  }
  func.func @transform_1(%arg0: i32, %arg1: i32) -> (i32, i32) {
    %c2_i32 = arith.constant 2 : i32
    %0 = arith.muli %arg0, %c2_i32 : i32
    %1 = arith.addi %0, %arg1 : i32
    %c2_i32_0 = arith.constant 2 : i32
    %2 = arith.minsi %1, %c2_i32_0 : i32
    %c0_i32 = arith.constant 0 : i32
    %c0_i32_1 = arith.constant 0 : i32
    return %2, %c0_i32 : i32, i32
  }
  func.func @transform_2(%arg0: i32, %arg1: i32) -> (i32, i32, i32) {
    %c0_i32 = arith.constant 0 : i32
    %c0_i32_0 = arith.constant 0 : i32
    %c0_i32_1 = arith.constant 0 : i32
    return %arg0, %c0_i32, %c0_i32_0 : i32, i32, i32
  }
}

</mosaic_0001>

<bundles_post_ra>
// kernel: tpu_custom_call.1
= control target key start
LH: loop header
LB: loop body
LE: loop exit
PB: predicated region body
PF: predicated region fallthrough
CT: control target
= control target key end

     0   :  { %s489_s9 = smov 0   ;;  %s491_s10 = smov 0   ;;  %s556_s0 = inlined_call_operand.vmem [shape: f32[24,32], index: 0, kind: input, shape index: {}]   ;;  %s557_s1 = inlined_call_operand.vmem [shape: s32[24,1], index: 1, kind: input, shape index: {}]   ;;  %s558_s2 = inlined_call_operand.vmem [shape: f32[2,1,1], index: 2, kind: output, shape index: {}]  }
   0x1   :  { %s493_s11 = smov 0   ;;  %s495_s12 = smov 0  }
   0x2   :  { %s497_s13 = smov 0  }
   0x3 LB: > { %s21_s14 = sadd.s32 1, %s462_s11  ;;  %s24_s15 = sadd.s32 1, %s466_s12  ;;  %s470_s13 = sphi %s497_s13, %s12_s13   ;;  %s466_s12 = sphi %s495_s12, %s562_s12   ;;  %s462_s11 = sphi %s493_s11, %s561_s11   ;;  %s458_s10 = sphi %s491_s10, %s560_s10   ;;  %s454_s9 = sphi %s489_s9, %s559_s9  }
   0x4   : > { %p22_p0 = scmp.ge.s32.totalorder %s21_s14, 2  ;;  %p365_p1 = scmp.ge.s32.totalorder %s470_s13, 1 }
   0x5   : > { %p164_p2 = scmp.lt.s32.totalorder %s470_s13, 5 }
   0x6   : > { %s564_s14 = smov (%p22_p0, %s21_s14), 0  ;;  %s566_s15 = smov (!%p22_p0, %s24_s15), %s466_s12 }
   0x7   : > { %p165_p3 = pnand %p365_p1, %p164_p2  ;;  %p26_p4 = scmp.ge.s32.totalorder %s566_s15, 2 }
   0x8   : > { %s366_s16 = sshll.u32 (!%p165_p3), %s458_s10, 1  ;;  %p219_p5 = scmp.lt.s32.totalorder (!%p165_p3), %s458_s10, 1 }
   0x9   : > { %s568_s15 = smov (%p26_p4, %s566_s15), 0  ;;  %168 = sbr.rel (%p165_p3) target bundleno = 487 (0x1e7), region = 28 }
   0xa   : > { %s519_s17 = sadd.s32 (!%p165_p3), %s454_s9, %s366_s16  ;;  %p376_p7 = scmp.ne.s32.totalorder (!%p165_p3), %s454_s9, 0 }
   0xb   : > { %p197_p6 = scmp.lt.s32.totalorder (!%p165_p3), %s519_s17, 2 }
   0xe   : > { %s570_s10 = smov (!%p219_p5, %s458_s10), 1 }
   0xf   : > { %s198_s18 = scalar_select %p197_p6, %s519_s17, 2 }
  0x10   : > { %s526_s21 = scalar_lea.vmem %s558_s2, %s570_s10  ;;  %225 = sbr.rel (%p376_p7) target bundleno = 23 (0x17), region = 32 }
  0x11   : > { %s572_s18 = smov (!%p197_p6, %s198_s18), 2 }
  0x12   : > { %s370_s22 = sshll.u32 %s572_s18, 3 }
  0x13   : > { %s202_s25 = scalar_lea.vmem %s556_s0, %s370_s22  ;;  %s214_s28 = scalar_lea.vmem %s557_s1, %s370_s22 }
  0x15   : > { %vm226_vm0 = vcmask 0   ;;  %v472_v0 = vmov 0.0  }
  0x16   : > { %227 = vst.msk [vmem:[%s526_s21] sm:$0x1] %vm226_vm0, %v472_v0 }
  0x17 PF: > { %v228_v1 = vld [vmem:[%s202_s25] sm:$0xff]  ;;  %vm245_vm1 = vcmask 261120   ;;  %v473_v3 = vmov 0   ;;  %v233_v10 = vlaneseq  ;;  %s378_s29 = sshll.u32 %s519_s17, 3  ;;  %vm272_vm4 = vcmask 7168  }
  0x18   : > { %v249_v2 = vsel %vm245_vm1, %v228_v1, -inf  ;;  %425 = vset.pattern.permute.xlu0 %v473_v3  ;;  %v229_v4 = vld [vmem:[%s214_s28] sm:$0xff]  ;;  %v235_v25 = vstv %s378_s29  ;;  %vm285_vm5 = vcmask 0  }
  0x19   : > { %250 = vmax.xlane.f32.xlu0 %v249_v2  ;;  %v239_v11 = vand.u32 127, %v233_v10  ;;  %v234_v24 = vshrl.u32 %v233_v10, 7 }
  0x1b   : > { %v236_v28 = vadd.s32 %v235_v25, %v234_v24 }
  0x1d   : > { %vm237_vm3 = vcmp.lt.s32.totalorder %v236_v28, 24  ;;  %v271_v41 = vld [vmem:[%s526_s21] sm:$0x1] }
  0x2d   : > { %241 = vperm.xlu0 %425, %v229_v4  }
  0x8c   : > { %v251_v5 = vpop.xlane.xlu0 %250 }
  0x8d   : > { %v252_v6 = vsub.f32 %v228_v1, %v251_v5 }
  0x8f   : > { %v253_v7 = vmul.f32 1.442695, %v252_v6 }
  0x91   : > { %426 = vpow2.f32 %v253_v7 }
  0x97   : > { %v427_v8 = vpop.eup %426 }
  0x98   : > { %v255_v9 = vsel %vm245_vm1, %v427_v8, 0.0 }
  0x99   : > { %256 = vadd.xlane.f32.xlu1 %v255_v9 }
  0x9f   : > { %v242_v12 = vpop.permute.xlu0 %241 }
  0xa0   : > { %vm243_vm2 = vcmp.eq.s32.totalorder %v239_v11, %v242_v12 }
  0xa1   : > { %v244_v13 = vsel %vm243_vm2, %v228_v1, 0.0 }
  0xa2   : > { %v246_v14 = vsel %vm245_vm1, %v244_v13, 0.0 }
  0xa3   : > { %247 = vadd.xlane.f32.xlu1 %v246_v14 }
 0x10c   : > { %v257_v15 = vpop.xlane.xlu1 %256 }
 0x10d   : > { %428 = vlog2.f32 %v257_v15 }
 0x113   : > { %v429_v16 = vpop.eup %428 }
 0x114   : > { %v259_v17 = vmul.f32 0.6931472, %v429_v16 }
 0x116   : > { %v260_v18 = vadd.f32 %v259_v17, %v251_v5  ;;  %v248_v19 = vpop.xlane.xlu1 %247 }
 0x118   : > { %v261_v20 = vsub.f32 %v260_v18, %v248_v19 }
 0x11a   : > { %v262_v21 = vmax.f32 %v261_v20, 0.0 }
 0x11c   : > { %v263_v22 = vsub.f32 0.0, %v262_v21 }
 0x11e   : > { %v264_v23 = vmul.f32 1.442695, %v263_v22 }
 0x120   : > { %430 = vpow2.f32 %v264_v23 }
 0x126   : > { %v431_v26 = vpop.eup %430 }
 0x127   : > { %v266_v27 = vsub.f32 1.0, %v431_v26 }
 0x129   : > { %v267_v29 = vmul.f32 %v266_v27, %v266_v27 }
 0x12b   : > { %v268_v30 = vmul.f32 0.25, %v267_v29 }
 0x12d   : > { %v269_v31 = vmul.f32 %v268_v30, %v262_v21 }
 0x12f   : > { %v270_v32 = vsel %vm237_vm3, %v269_v31, 0.0 }
 0x130   : > { %v273_v33 = vsel %vm272_vm4, %v270_v32, 0.0 }
 0x131   : > { %274 = vadd.xlane.f32.xlu2 %v273_v33 }
 0x1a4   : > { %v275_v34 = vpop.xlane.xlu2 %274 }
 0x1a5   : > { %v276_v35 = vrot.slane %v275_v34, 4 }
 0x1a7   : > { %v277_v36 = vadd.f32 %v276_v35, %v275_v34 }
 0x1a9   : > { %v278_v37 = vrot.slane %v277_v36, 2 }
 0x1ab   : > { %v279_v38 = vadd.f32 %v278_v37, %v277_v36 }
 0x1ad   : > { %v280_v39 = vrot.slane %v279_v38, 1 }
 0x1af   : > { %v281_v40 = vadd.f32 %v280_v39, %v279_v38 }
 0x1b1   : > { %381 = vpush %v281_v40 }
 0x1e2   : > { %s382_s30 = spop %381 }
 0x1e3   : > { %v283_v42 = vstv %s382_s30 }
 0x1e4   : > { %v284_v43 = vadd.f32 %v283_v42, %v271_v41 }
 0x1e6   : > { %286 = vst.msk [vmem:[%s526_s21] sm:$0x1] %vm285_vm5, %v284_v43 }
 0x1e7 PF: > { %s12_s13 = sadd.s32 1, %s470_s13   ;;  %s559_s9 = smov %s462_s11 }
 0x1e8   : > { %p9_p8 = scmp.ge.s32.totalorder %s12_s13, 6   ;;  %s560_s10 = smov %s466_s12 }
 0x1e9   : > { %s561_s11 = smov %s564_s14  ;;  %s562_s12 = smov %s568_s15 }
 0x1ea   :  { %11 = sbr.rel (!%p9_p8) target bundleno = 3 (0x3), region = 65 }

</bundles_post_ra>
